<compile_context>
chip_gen: v7x
topology: tpu7x:2x2x1
jax: 0.10.0
libtpu: 0.0.40
codegen_flags: <defaults>
</compile_context>

<pallas_src>
import numpy as np
import jax
import jax.numpy as jnp
from jax.experimental import pallas as pl
from jax.experimental.pallas import tpu as pltpu

# ----------------------------------------------------------------------------
# Synthetic (deterministic) matrix-form NSGT configuration
# ----------------------------------------------------------------------------
NB_SAMPLES  = 2
NB_CHANNELS = 2
N_BINS      = 8        # frequency channels
M_FRAMES    = 32       # time frames per channel (constant: matrix / zeropad form)
NN          = 256      # full-spectrum length used by the synthesis
LS          = 256      # output signal length (== `length` argument)

_WINS = np.array([0, 16, 32, 56, 88, 128, 176, 224])   # center frequency bins
_LGS  = np.array([8, 8, 12, 16, 20, 24, 28, 32])        # dual-window lengths (<= M)


def _dual_windows():
    gd = []
    for Lg in _LGS:
        n = np.arange(Lg)
        g = 0.5 - 0.5 * np.cos(2.0 * np.pi * (n + 0.5) / Lg)   # Hann, deterministic
        g = g / (np.sum(g) + 1e-12)
        gd.append(g)
    return gd


def _nsigtf_complex_np(C):
    """Matrix-form inverse NSGT synthesis (before taking the real part).

    C: (rows, N_BINS, M_FRAMES) complex coefficients -> (rows, LS) complex.
    Per bin: FFT over time frames, multiply by the dual window, circular
    scatter-add into the full spectrum around the bin's center frequency,
    then a single inverse FFT back to the time domain.
    """
    gd = _dual_windows()
    fc = np.fft.fft(C, axis=-1)                              # per-bin FFT over frames
    fr = np.zeros((C.shape[0], NN), dtype=np.complex128)
    for k in range(N_BINS):
        Lg = int(_LGS[k]); w = int(_WINS[k]); g = gd[k]
        for li, l in enumerate(range(-(Lg // 2), Lg - Lg // 2)):
            fr[:, (w + l) % NN] += fc[:, k, l % M_FRAMES] * g[li]
    return np.fft.ifft(fr, axis=-1)[:, :LS]


def _build_synthesis_matrix():
    """Interleaved real synthesis matrix B of shape (2K, LS), float32.

    Row 2j   =  Re(Bc[j])
    Row 2j+1 = -Im(Bc[j])
    so that  Xf @ B == Re( C @ Bc )  when Xf carries (re, im) interleaved on the
    last axis exactly as stored in the (..., n_bins, n_frames, 2) input tensor.
    """
    K = N_BINS * M_FRAMES
    basis = np.zeros((K, N_BINS, M_FRAMES), dtype=np.complex128)
    idx = np.arange(K)
    basis[idx, idx // M_FRAMES, idx % M_FRAMES] = 1.0
    Bc = _nsigtf_complex_np(basis)                           # (K, LS) complex
    B = np.empty((2 * K, LS), dtype=np.float32)
    B[0::2] = Bc.real.astype(np.float32)
    B[1::2] = (-Bc.imag).astype(np.float32)                  # Im sign baked in once here
    return B


# ----------------------------------------------------------------------------
# Pallas kernel: y = Xf @ B   (fused real-part of complex synthesis matmul)
# ----------------------------------------------------------------------------
def _insgt_kernel(x_ref, b_ref, o_ref):
    # x arrives f32 in its natural layout (tiny: R x 2K); cast to bf16 so the
    # MXU runs a true-bf16 single-pass matmul against the bf16-stored B.
    # Accumulation / output stay f32.
    o_ref[...] = jnp.dot(x_ref[...].astype(jnp.bfloat16), b_ref[...],
                         preferred_element_type=jnp.float32)


def insgt_backward_pallas(Xf, B):
    """Xf: (R, 2K) f32 natural-layout coefficients; B: (2K, N) bf16 synthesis."""
    R, K2 = Xf.shape
    K2b, N = B.shape
    assert K2 == K2b and N % 128 == 0

    # Pad rows to a multiple of 8 -> full (8,128) f32 tiles (no masked sublanes).
    Rp = ((R + 7) // 8) * 8
    if Rp != R:
        Xf = jnp.pad(Xf, ((0, Rp - R), (0, 0)))

    # Whole problem is VMEM-resident -> no grid, no pipeline, no double buffers:
    # full-array VMEM refs, single kernel invocation, direct write to o_ref.
    y = pl.pallas_call(
        _insgt_kernel,
        out_shape=jax.ShapeDtypeStruct((Rp, N), jnp.float32),
        in_specs=[
            pl.BlockSpec(memory_space=pltpu.MemorySpace.VMEM),   # Xf, full array
            pl.BlockSpec(memory_space=pltpu.MemorySpace.VMEM),   # B,  full array
        ],
        out_specs=pl.BlockSpec(memory_space=pltpu.MemorySpace.VMEM),
        cost_estimate=pl.CostEstimate(
            flops=2 * Rp * K2 * N,
            transcendentals=0,
            bytes_accessed=Rp * K2 * 4 + K2 * N * 2 + Rp * N * 4),
    )(Xf, B)
    return y[:R]


# ----------------------------------------------------------------------------
# TorchINSGT.forward equivalent (single-Tensor, matrixform='zeropad' path)
# ----------------------------------------------------------------------------
def torch_insgt_forward(X, length, B):
    # X: (nb_samples, nb_channels, n_bins, n_frames, 2) float32  (re/im last, as
    #    consumed by torch.view_as_complex)
    nb_samples, nb_channels, n_bins, n_frames, two = X.shape
    assert two == 2
    shape = (nb_samples, nb_channels, n_bins, n_frames)        # complex-view shape

    # Natural-layout flatten: (samples*channels, n_bins*n_frames*2) with re/im
    # interleaved on the last axis - no strided de-interleave copies.
    # (For repeated use, stack many clips here so R >= 128 before the call.)
    Xf = X.reshape(nb_samples * nb_channels, n_bins * n_frames * 2)

    # nsgt.backward: real part of the complex-linear synthesis (one Pallas matmul)
    y = insgt_backward_pallas(Xf, B)                           # (rows, LS)
    assert length <= y.shape[-1], "requested length exceeds synthesized signal"
    y = y[:, :length]

    # y.view(*shape[:-2], -1)
    return y.reshape(*shape[:-2], -1)


if __name__ == "__main__":
    B_f32 = _build_synthesis_matrix()                # (512, 256) f32 host-side
    B = jnp.asarray(B_f32, dtype=jnp.bfloat16)       # stored / streamed as bf16

    key = jax.random.PRNGKey(0)
    X = jax.random.normal(
        key, (NB_SAMPLES, NB_CHANNELS, N_BINS, M_FRAMES, 2), dtype=jnp.float32)

    y = torch_insgt_forward(X, LS, B)
    y = jax.block_until_ready(y)
    assert y.shape == (NB_SAMPLES, NB_CHANNELS, LS)
    y_np = np.asarray(y)

    # --- Check 1: kernel mechanics vs a same-precision numpy matmul ----------
    # (bf16-rounded operands, f32 accumulation -> only accumulation-order noise)
    Xf_np = np.asarray(X, dtype=np.float32).reshape(
        NB_SAMPLES * NB_CHANNELS, N_BINS * M_FRAMES * 2)
    Xb = np.asarray(jnp.asarray(Xf_np).astype(jnp.bfloat16).astype(jnp.float32))
    Bb = np.asarray(B.astype(jnp.float32))
    y_mm = (Xb @ Bb).reshape(NB_SAMPLES, NB_CHANNELS, LS)
    np.testing.assert_allclose(y_np, y_mm, rtol=1e-3, atol=1e-5)

    # --- Check 2: end-to-end semantics vs float64 inverse-NSGT FFT reference --
    Xn = np.asarray(X).astype(np.float64)
    Cc = (Xn[..., 0] + 1j * Xn[..., 1]).reshape(
        NB_SAMPLES * NB_CHANNELS, N_BINS, M_FRAMES)
    y_ref = _nsigtf_complex_np(Cc).real.reshape(NB_SAMPLES, NB_CHANNELS, -1)
    scale = float(np.sqrt(np.mean(y_ref ** 2)))      # signal-rms scale for bf16 tol
    np.testing.assert_allclose(y_np, y_ref, rtol=0.0, atol=5e-2 * scale)

    print("KERNEL_OK")
</pallas_src>

<mosaic_0001>
module attributes {stable_mosaic.version = 11 : i64} {
  func.func @_insgt_kernel(%arg0: memref<8x512xf32, #tpu.memory_space<vmem>>, %arg1: memref<512x256xbf16, #tpu.memory_space<vmem>>, %arg2: memref<8x256xf32, #tpu.memory_space<vmem>>) attributes {dimension_semantics = [], scalar_prefetch = 0 : i64, scratch_operands = 0 : i64, tpu.core_type = #tpu.core_type<tc>} {
    %c0 = arith.constant 0 : index
    %c0_0 = arith.constant 0 : index
    %0 = vector.load %arg0[%c0, %c0_0] : memref<8x512xf32, #tpu.memory_space<vmem>>, vector<8x512xf32>
    %1 = arith.truncf %0 : vector<8x512xf32> to vector<8x512xbf16>
    %c0_1 = arith.constant 0 : index
    %c0_2 = arith.constant 0 : index
    %2 = vector.load %arg1[%c0_1, %c0_2] : memref<512x256xbf16, #tpu.memory_space<vmem>>, vector<512x256xbf16>
    %cst = arith.constant dense<0.000000e+00> : vector<8x256xf32>
    %3 = tpu.matmul %1, %2, %cst {dimension_numbers = #tpu.dot_dimension_numbers<[1], [0], [0], [1], [0, 0, 1, 1], [], []>} : vector<8x512xbf16>, vector<512x256xbf16>, vector<8x256xf32> -> vector<8x256xf32>
    %c0_3 = arith.constant 0 : index
    %c0_4 = arith.constant 0 : index
    %4 = vector.load %arg2[%c0_3, %c0_4] : memref<8x256xf32, #tpu.memory_space<vmem>>, vector<8x256xf32>
    tpu.vector_store %arg2[%c0_3, %c0_4], %3 {strides = array<i32>} : memref<8x256xf32, #tpu.memory_space<vmem>>, vector<8x256xf32>,
    return
  }
}

</mosaic_0001>

<bundles_post_ra>
// kernel: tpu_custom_call.1
= control target key start
LH: loop header
LB: loop body
LE: loop exit
PB: predicated region body
PF: predicated region fallthrough
CT: control target
= control target key end

     0   :  { %7 = vsyncpa [#allocation3], 0  ;;  %s832_s0 = inlined_call_operand.hbm [shape: f32[8,512], index: 0, kind: input, shape index: {}]   ;;  %s833_s1 = inlined_call_operand.hbm [shape: bf16[512,256], index: 1, kind: input, shape index: {}]   ;;  %s834_s2 = inlined_call_operand.hbm [shape: f32[8,256], index: 2, kind: output, shape index: {}]  }
   0x1   :  { %8 = vsyncpa [#allocation6], 0 }
   0x2   :  { %9 = vsyncpa [#allocation4], 0  ;;  %s769_s9 = smov [#allocation2]   ;;  %s770_s11 = smov [#allocation5]  }
   0x3   :  { %s16_s10 = sshll.u32 %s769_s9, 4  ;;  %s25_s12 = sshll.u32 %s770_s11, 4  ;;  %s17_s10 = int_to_ptr.vmem [resolvable:$true] %s16_s10  ;;  %s789_s12 = int_to_ptr.vmem [resolvable:$true] %s25_s12 }
   0x4   :  { %s697_s15 = scalar_lea.hbm %s832_s0, 512 }
   0x5   :  { %p698_p0 = scmp.ne.s32.totalorder %s832_s0, %s697_s15  ;;  %p701_p1 = scmp.lt.u32.totalorder %s697_s15, %s832_s0 }
   0x7   :  { %p703_p2 = pnand %p701_p1, %p698_p0 }
   0x9   :  { %706 = shalt.err (!%p703_p2)
}
   0xa   :  { %s707_s20 = scalar_lea.vmem %s17_s10, 512  ;;  %p712_p4 = scmp.lt.s32.totalorder %s17_s10, %s17_s10 }
   0xb   :  { %p708_p3 = scmp.ne.s32.totalorder %s17_s10, %s707_s20  ;;  %p713_p5 = scmp.lt.s32.totalorder %s707_s20, %s707_s20 }
   0xd   :  { %p714_p6 = por %p713_p5, %p712_p4 }
   0xf   :  { %p715_p7 = pnand %p714_p6, %p708_p3 }
  0x11   :  { %718 = shalt.err (!%p715_p7)
}
  0x12   :  { %19 = dma.hbm_to_vmem [thread:$0]  %s832_s0, 512, %s17_s10, [#allocation3]  }
  0x13   :  { %s719_s25 = scalar_lea.hbm %s833_s1, 8192 }
  0x14   :  { %p720_p8 = scmp.ne.s32.totalorder %s833_s1, %s719_s25  ;;  %p723_p9 = scmp.lt.u32.totalorder %s719_s25, %s833_s1 }
  0x16   :  { %p725_p10 = pnand %p723_p9, %p720_p8 }
  0x18   :  { %728 = shalt.err (!%p725_p10)
}
  0x19   :  { %s729_s30 = scalar_lea.vmem %s789_s12, 8192  ;;  %p734_p12 = scmp.lt.s32.totalorder %s789_s12, %s789_s12 }
  0x1a   :  { %p730_p11 = scmp.ne.s32.totalorder %s789_s12, %s729_s30  ;;  %p735_p13 = scmp.lt.s32.totalorder %s729_s30, %s729_s30 }
  0x1c   :  { %p736_p0 = por %p735_p13, %p734_p12 }
  0x1e   :  { %p737_p1 = pnand %p736_p0, %p730_p11 }
  0x20   :  { %740 = shalt.err (!%p737_p1)
}
  0x21   :  { %s771_s0 = smov 128   ;;  %s772_s3 = smov 8  }
  0x22   :  { %31 = dma.hbm_to_vmem [thread:$0]  %s833_s1, 8192, %s789_s12, [#allocation6], %s771_s0, %s771_s0, %s772_s3  }
  0x23   :  { %763 = dma.done.wait [#allocation3], 512  }
  0x24   :  { %764 = vsyncadd [#allocation3], 4294966784 }
  0x25   :  { %765 = dma.done.wait [#allocation6], 8192  }
  0x26   :  { %766 = vsyncadd [#allocation6], 4294959104  ;;  %v601_v0 = vld [vmem:[#allocation5 + $0x4] ss:$8 sps:$4 sm:$0xff]   ;;  %v605_v2 = vld [vmem:[#allocation5] ss:$8 sps:$4 sm:$0xff]  }
  0x27   :  { %v603_v1 = vld [vmem:[#allocation5 + $0x104] ss:$8 sps:$4 sm:$0xff]   ;;  %430 = vmatprep.subr.bf16.mxu1 %v601_v0  ;;  %v606_v3 = vld [vmem:[#allocation5 + $0x100] ss:$8 sps:$4 sm:$0xff]   ;;  %v607_v4 = vld [vmem:[#allocation5 + $0x14] ss:$8 sps:$4 sm:$0xff]  }
  0x28   :  { %471 = vmatprep.subr.bf16.mxu0 %v603_v1  ;;  %431 = vmatpush1.bf16.msra.mxu1 %v605_v2  ;;  %v609_v5 = vld [vmem:[#allocation5 + $0x114] ss:$8 sps:$4 sm:$0xff]   ;;  %v611_v6 = vld [vmem:[#allocation5 + $0x10] ss:$8 sps:$4 sm:$0xff]   ;;  %v613_v8 = vld [vmem:[#allocation5 + $0x24] ss:$8 sps:$4 sm:$0xff]  }
  0x29   :  { %472 = vmatpush1.bf16.msra.mxu0 %v606_v3  ;;  %432 = vmatprep.subr.bf16.mxu1 %v607_v4  ;;  %v612_v7 = vld [vmem:[#allocation5 + $0x110] ss:$8 sps:$4 sm:$0xff]   ;;  %v615_v9 = vld [vmem:[#allocation5 + $0x124] ss:$8 sps:$4 sm:$0xff]   ;;  %v617_v10 = vld [vmem:[#allocation5 + $0x20] ss:$8 sps:$4 sm:$0xff]  }
  0x2a   :  { %473 = vmatprep.subr.bf16.mxu0 %v609_v5  ;;  %v618_v11 = vld [vmem:[#allocation5 + $0x120] ss:$8 sps:$4 sm:$0xff]   ;;  %v619_v12 = vld [vmem:[#allocation5 + $0x34] ss:$8 sps:$4 sm:$0xff]   ;;  %v623_v14 = vld [vmem:[#allocation5 + $0x30] ss:$8 sps:$4 sm:$0xff]  }
  0x2b   :  { %v621_v13 = vld [vmem:[#allocation5 + $0x134] ss:$8 sps:$4 sm:$0xff]   ;;  %v624_v15 = vld [vmem:[#allocation5 + $0x130] ss:$8 sps:$4 sm:$0xff]   ;;  %v625_v16 = vld [vmem:[#allocation5 + $0x44] ss:$8 sps:$4 sm:$0xff]  }
  0x2c   :  { %433 = vmatpush1.bf16.msra.mxu1 %v611_v6  ;;  %v627_v17 = vld [vmem:[#allocation5 + $0x144] ss:$8 sps:$4 sm:$0xff]   ;;  %v629_v18 = vld [vmem:[#allocation5 + $0x40] ss:$8 sps:$4 sm:$0xff]   ;;  %v631_v20 = vld [vmem:[#allocation5 + $0x54] ss:$8 sps:$4 sm:$0xff]  }
  0x2d   :  { %474 = vmatpush1.bf16.msra.mxu0 %v612_v7  ;;  %434 = vmatprep.subr.bf16.mxu1 %v613_v8  ;;  %v630_v19 = vld [vmem:[#allocation5 + $0x140] ss:$8 sps:$4 sm:$0xff]   ;;  %v633_v21 = vld [vmem:[#allocation5 + $0x154] ss:$8 sps:$4 sm:$0xff]   ;;  %v635_v22 = vld [vmem:[#allocation5 + $0x50] ss:$8 sps:$4 sm:$0xff]  }
  0x2e   :  { %475 = vmatprep.subr.bf16.mxu0 %v615_v9  ;;  %v636_v23 = vld [vmem:[#allocation5 + $0x150] ss:$8 sps:$4 sm:$0xff]   ;;  %v637_v24 = vld [vmem:[#allocation5 + $0x64] ss:$8 sps:$4 sm:$0xff]   ;;  %v641_v26 = vld [vmem:[#allocation5 + $0x60] ss:$8 sps:$4 sm:$0xff]  }
  0x2f   :  { %v639_v25 = vld [vmem:[#allocation5 + $0x164] ss:$8 sps:$4 sm:$0xff]   ;;  %v642_v27 = vld [vmem:[#allocation5 + $0x160] ss:$8 sps:$4 sm:$0xff]   ;;  %v643_v28 = vld [vmem:[#allocation5 + $0x74] ss:$8 sps:$4 sm:$0xff]  }
  0x30   :  { %435 = vmatpush1.bf16.msra.mxu1 %v617_v10  ;;  %v645_v29 = vld [vmem:[#allocation5 + $0x174] ss:$8 sps:$4 sm:$0xff]   ;;  %v647_v30 = vld [vmem:[#allocation5 + $0x70] ss:$8 sps:$4 sm:$0xff]   ;;  %v649_v32 = vld [vmem:[#allocation5 + $0x84] ss:$8 sps:$4 sm:$0xff]  }
  0x31   :  { %476 = vmatpush1.bf16.msra.mxu0 %v618_v11  ;;  %436 = vmatprep.subr.bf16.mxu1 %v619_v12  ;;  %v648_v31 = vld [vmem:[#allocation5 + $0x170] ss:$8 sps:$4 sm:$0xff]   ;;  %v651_v33 = vld [vmem:[#allocation5 + $0x184] ss:$8 sps:$4 sm:$0xff]   ;;  %v653_v34 = vld [vmem:[#allocation5 + $0x80] ss:$8 sps:$4 sm:$0xff]  }
  0x32   :  { %477 = vmatprep.subr.bf16.mxu0 %v621_v13  ;;  %v654_v35 = vld [vmem:[#allocation5 + $0x180] ss:$8 sps:$4 sm:$0xff]   ;;  %v655_v36 = vld [vmem:[#allocation5 + $0x94] ss:$8 sps:$4 sm:$0xff]   ;;  %v659_v38 = vld [vmem:[#allocation5 + $0x90] ss:$8 sps:$4 sm:$0xff]  }
  0x33   :  { %v657_v37 = vld [vmem:[#allocation5 + $0x194] ss:$8 sps:$4 sm:$0xff]   ;;  %v660_v39 = vld [vmem:[#allocation5 + $0x190] ss:$8 sps:$4 sm:$0xff]   ;;  %v661_v40 = vld [vmem:[#allocation5 + $0xa4] ss:$8 sps:$4 sm:$0xff]  }
  0x34   :  { %437 = vmatpush1.bf16.msra.mxu1 %v623_v14  ;;  %v663_v41 = vld [vmem:[#allocation5 + $0x1a4] ss:$8 sps:$4 sm:$0xff]   ;;  %v665_v42 = vld [vmem:[#allocation5 + $0xa0] ss:$8 sps:$4 sm:$0xff]   ;;  %v667_v44 = vld [vmem:[#allocation5 + $0xb4] ss:$8 sps:$4 sm:$0xff]  }
  0x35   :  { %478 = vmatpush1.bf16.msra.mxu0 %v624_v15  ;;  %438 = vmatprep.subr.bf16.mxu1 %v625_v16  ;;  %v666_v43 = vld [vmem:[#allocation5 + $0x1a0] ss:$8 sps:$4 sm:$0xff]   ;;  %v669_v45 = vld [vmem:[#allocation5 + $0x1b4] ss:$8 sps:$4 sm:$0xff]   ;;  %v671_v49 = vld [vmem:[#allocation5 + $0xb0] ss:$8 sps:$4 sm:$0xff]  }
  0x36   :  { %479 = vmatprep.subr.bf16.mxu0 %v627_v17  ;;  %v39_v46 = vld [vmem:[#allocation2 + $0x8] sm:$0xff]  ;;  %v41_v48 = vld [vmem:[#allocation2 + $0x18] sm:$0xff]  ;;  %v38_v4 = vld [vmem:[#allocation2] sm:$0xff]  ;;  %s773_s1 = smov [#allocation7]  }
  0x37   :  { %v43_v47 = vpack.c.bf16 %v39_v46, %v39_v46  ;;  %v672_v50 = vld [vmem:[#allocation5 + $0x1b0] ss:$8 sps:$4 sm:$0xff]   ;;  %v45_v51 = vpack.c.bf16 %v41_v48, %v41_v48  ;;  %v673_v52 = vld [vmem:[#allocation5 + $0xc4] ss:$8 sps:$4 sm:$0xff]   ;;  %v677_v54 = vld [vmem:[#allocation5 + $0xc0] ss:$8 sps:$4 sm:$0xff]   ;;  %v42_v6 = vpack.c.bf16 %v38_v4, %v38_v4 }
  0x38   :  { %439 = vmatpush1.bf16.msra.mxu1 %v629_v18  ;;  %v675_v53 = vld [vmem:[#allocation5 + $0x1c4] ss:$8 sps:$4 sm:$0xff]   ;;  %v678_v55 = vld [vmem:[#allocation5 + $0x1c0] ss:$8 sps:$4 sm:$0xff]   ;;  %v679_v56 = vld [vmem:[#allocation5 + $0xd4] ss:$8 sps:$4 sm:$0xff]  }
  0x39   :  { %480 = vmatpush1.bf16.msra.mxu0 %v630_v19  ;;  %440 = vmatprep.subr.bf16.mxu1 %v631_v20  ;;  %v681_v57 = vld [vmem:[#allocation5 + $0x1d4] ss:$8 sps:$4 sm:$0xff]   ;;  %v683_v58 = vld [vmem:[#allocation5 + $0xd0] ss:$8 sps:$4 sm:$0xff]   ;;  %v685_v60 = vld [vmem:[#allocation5 + $0xe4] ss:$8 sps:$4 sm:$0xff]  }
  0x3a   :  { %481 = vmatprep.subr.bf16.mxu0 %v633_v21  ;;  %462 = vmatprep.mubr.bf16.mxu1 %v43_v47  ;;  %v684_v59 = vld [vmem:[#allocation5 + $0x1d0] ss:$8 sps:$4 sm:$0xff]   ;;  %v687_v61 = vld [vmem:[#allocation5 + $0x1e4] ss:$8 sps:$4 sm:$0xff]   ;;  %v689_v62 = vld [vmem:[#allocation5 + $0xe0] ss:$8 sps:$4 sm:$0xff]  }
  0x3b   :  { %503 = vmatprep.mubr.bf16.mxu0 %v45_v51  ;;  %v690_v63 = vld [vmem:[#allocation5 + $0x1e0] ss:$8 sps:$4 sm:$0xff]   ;;  %v691_v0 = vld [vmem:[#allocation5 + $0xf4] ss:$8 sps:$4 sm:$0xff]   ;;  %v695_v2 = vld [vmem:[#allocation5 + $0xf0] ss:$8 sps:$4 sm:$0xff]  }
  0x3c   :  { %441 = vmatpush1.bf16.msra.mxu1 %v635_v22  ;;  %v693_v1 = vld [vmem:[#allocation5 + $0x1f4] ss:$8 sps:$4 sm:$0xff]   ;;  %v696_v3 = vld [vmem:[#allocation5 + $0x1f0] ss:$8 sps:$4 sm:$0xff]   ;;  %s520_s6 = sshll.u32 %s773_s1, 4  ;;  %s521_s6 = int_to_ptr.vmem [resolvable:$true] %s520_s6 }
  0x3d   :  { %482 = vmatpush1.bf16.msra.mxu0 %v636_v23  ;;  %442 = vmatprep.subr.bf16.mxu1 %v637_v24  ;;  %v40_v5 = vld [vmem:[#allocation2 + $0x10] sm:$0xff]  ;;  %s741_s7 = scalar_lea.vmem %s521_s6, 256  ;;  %p746_p3 = scmp.lt.s32.totalorder %s521_s6, %s521_s6 }
  0x3e   :  { %483 = vmatprep.subr.bf16.mxu0 %v639_v25  ;;  %v44_v7 = vpack.c.bf16 %v40_v5, %v40_v5  ;;  %p742_p2 = scmp.ne.s32.totalorder %s521_s6, %s741_s7  ;;  %p747_p4 = scmp.lt.s32.totalorder %s741_s7, %s741_s7 }
  0x40   :  { %443 = vmatpush1.bf16.msra.mxu1 %v641_v26  ;;  %p748_p5 = por %p747_p4, %p746_p3 }
  0x41   :  { %484 = vmatpush1.bf16.msra.mxu0 %v642_v27  ;;  %444 = vmatprep.subr.bf16.mxu1 %v643_v28 }
  0x42   :  { %485 = vmatprep.subr.bf16.mxu0 %v645_v29  ;;  %p749_p6 = pnand %p748_p5, %p742_p2 }
  0x44   :  { %445 = vmatpush1.bf16.msra.mxu1 %v647_v30 }
  0x45   :  { %486 = vmatpush1.bf16.msra.mxu0 %v648_v31  ;;  %446 = vmatprep.subr.bf16.mxu1 %v649_v32 }
  0x46   :  { %487 = vmatprep.subr.bf16.mxu0 %v651_v33 }
  0x48   :  { %447 = vmatpush1.bf16.msra.mxu1 %v653_v34 }
  0x49   :  { %488 = vmatpush1.bf16.msra.mxu0 %v654_v35  ;;  %448 = vmatprep.subr.bf16.mxu1 %v655_v36 }
  0x4a   :  { %489 = vmatprep.subr.bf16.mxu0 %v657_v37 }
  0x4c   :  { %449 = vmatpush1.bf16.msra.mxu1 %v659_v38 }
  0x4d   :  { %490 = vmatpush1.bf16.msra.mxu0 %v660_v39  ;;  %450 = vmatprep.subr.bf16.mxu1 %v661_v40 }
  0x4e   :  { %491 = vmatprep.subr.bf16.mxu0 %v663_v41 }
  0x50   :  { %451 = vmatpush1.bf16.msra.mxu1 %v665_v42 }
  0x51   :  { %492 = vmatpush1.bf16.msra.mxu0 %v666_v43  ;;  %452 = vmatprep.subr.bf16.mxu1 %v667_v44 }
  0x52   :  { %493 = vmatprep.subr.bf16.mxu0 %v669_v45 }
  0x54   :  { %453 = vmatpush1.bf16.msra.mxu1 %v671_v49 }
  0x55   :  { %494 = vmatpush1.bf16.msra.mxu0 %v672_v50  ;;  %454 = vmatprep.subr.bf16.mxu1 %v673_v52 }
  0x56   :  { %495 = vmatprep.subr.bf16.mxu0 %v675_v53 }
  0x58   :  { %455 = vmatpush1.bf16.msra.mxu1 %v677_v54 }
  0x59   :  { %496 = vmatpush1.bf16.msra.mxu0 %v678_v55  ;;  %456 = vmatprep.subr.bf16.mxu1 %v679_v56 }
  0x5a   :  { %497 = vmatprep.subr.bf16.mxu0 %v681_v57 }
  0x5c   :  { %457 = vmatpush1.bf16.msra.mxu1 %v683_v58 }
  0x5d   :  { %498 = vmatpush1.bf16.msra.mxu0 %v684_v59  ;;  %458 = vmatprep.subr.bf16.mxu1 %v685_v60 }
  0x5e   :  { %499 = vmatprep.subr.bf16.mxu0 %v687_v61 }
  0x60   :  { %459 = vmatpush1.bf16.msra.mxu1 %v689_v62 }
  0x61   :  { %500 = vmatpush1.bf16.msra.mxu0 %v690_v63  ;;  %460 = vmatprep.subr.bf16.mxu1 %v691_v0 }
  0x62   :  { %501 = vmatprep.subr.bf16.mxu0 %v693_v1 }
  0x64   :  { %461 = vmatpush1.bf16.msra.mxu1 %v695_v2 }
  0x65   :  { %502 = vmatpush1.bf16.msra.mxu0 %v696_v3 }
  0x67   :  { %463 = vmatmul.mubr.bf16.vlgmr.msra.gmra.mrb[0].mxu1 %v42_v6 }
  0x68   :  { %504 = vmatmul.mubr.bf16.vlgmr.msra.gmra.mrb[0].mxu0 %v44_v7 }
 0x13a   :  { %v464_v8 = vpop.f32.mrb[0].mxu1 }
 0x13b   :  { %v505_v9 = vpop.f32.mrb[0].mxu0  ;;  %v466_v11 = vpop.f32.mrb[1].mxu1 }
 0x13c   :  { %v506_v10 = vadd.f32 %v505_v9, %v464_v8  ;;  %v507_v12 = vpop.f32.mrb[1].mxu0  ;;  %v468_v14 = vpop.f32.mrb[2].mxu1 }
 0x13d   :  { %v508_v13 = vadd.f32 %v507_v12, %v466_v11  ;;  %v509_v15 = vpop.f32.mrb[2].mxu0  ;;  %v469_v16 = vpop.f32.mrb[3].mxu1 }
 0x13e   :  { %512 = vst [vmem:[#allocation7] sm:$0xff] %v506_v10  ;;  %v510_v17 = vpop.f32.mrb[3].mxu0 }
 0x13f   :  { %513 = vst [vmem:[#allocation7 + $0x8] sm:$0xff] %v508_v13 }
 0x140   :  { %752 = shalt.err (!%p749_p6)
}
 0x141   :  { %s753_s10 = scalar_lea.hbm %s834_s2, 256 }
 0x142   :  { %p754_p7 = scmp.ne.s32.totalorder %s834_s2, %s753_s10  ;;  %p757_p8 = scmp.lt.u32.totalorder %s753_s10, %s834_s2 }
 0x144   :  { %p759_p9 = pnand %p757_p8, %p754_p7 }
 0x146   :  { %762 = shalt.err (!%p759_p9)
}
 0x147   :  { %523 = dma.vmem_to_hbm [thread:$0]  %s521_s6, 256, %s834_s2, [#allocation4]  }
 0x148   :  { %767 = dma.done.wait [#allocation4], 256  }
 0x149   :  { %768 = vsyncadd [#allocation4], 4294967040 }
 0x14a   :  { %527 = vsyncpa [#allocation3], 1 }
 0x14b   :  { %528 = vsyncpa [#allocation6], 1 }
 0x14c   :  { %529 = vsyncpa [#allocation4], 1 }

</bundles_post_ra>
